<compile_context>
chip_gen: v5e
topology: v5e:2x2
jax: 0.10.0
libtpu: 0.0.40
codegen_flags: <defaults>
</compile_context>

<pallas_src>
import functools

import jax
import jax.numpy as jnp
from jax import lax
from jax.experimental import pallas as pl
from jax.experimental.pallas import tpu as pltpu


def _round_up(x, m):
    return (x + m - 1) // m * m


def _tpu_defaults():
    """Generation-gated VMEM budget / M-tile (v5e/v6e: 128 MiB VMEM, v7x: 64 MiB)."""
    cap = 64 * 1024 * 1024
    try:
        info = pltpu.get_tpu_info()
        cap = int(getattr(info, "vmem_capacity_bytes", cap))
    except Exception:
        pass
    if cap >= 96 * 1024 * 1024:            # v5e / v6e
        return min(100 * 1024 * 1024, cap * 3 // 4), 512
    return 48 * 1024 * 1024, 256           # v7x


_VMEM_LIMIT, _TM = _tpu_defaults()
_TN = 256


# ----------------------------------------------------------------------------
# Matmul kernel: single full-extent K block, bf16 x bf16 -> f32, fused bias /
# activation, optional fused (masked) BatchNorm partial statistics.
# ----------------------------------------------------------------------------
def _mm_kernel(a_ref, b_ref, bias_ref, o_ref, *stats_refs, act, bn_stats,
               m_valid, tm):
    y = jnp.dot(a_ref[...], b_ref[...], preferred_element_type=jnp.float32)
    y = y + bias_ref[...]
    if act == "relu":
        y = jnp.maximum(y, 0.0)
    elif act == "sigmoid":
        y = jax.nn.sigmoid(y)
    o_ref[...] = y.astype(o_ref.dtype)
    if bn_stats:
        st_ref = stats_refs[0]
        rows = (pl.program_id(0) * tm
                + lax.broadcasted_iota(jnp.int32, (tm, 1), 0))
        # Edge M tiles may contain garbage rows; exclude them from the sums.
        ym = jnp.where(rows < m_valid, y, 0.0)
        st_ref[0, 0, :] = jnp.sum(ym, axis=0)
        st_ref[0, 1, :] = jnp.sum(ym * ym, axis=0)


def pallas_matmul(a, b, bias=None, act=None, out_dtype=jnp.float32,
                  bn_stats=False):
    """(M,K) @ (K,N) [+ bias] [act].  Optionally also returns BN sum/sumsq."""
    M, K = a.shape
    K2, N = b.shape
    assert K == K2
    assert K <= 8192, "single full-K block assumed (ResNet-50 K <= 4608)"
    assert not (bn_stats and act is not None)
    a = a.astype(jnp.bfloat16)
    b = b.astype(jnp.bfloat16)
    if bias is None:
        bias = jnp.zeros((N,), jnp.float32)
    bias2 = bias.astype(jnp.float32).reshape(1, N)

    tm = _TM if M >= _TM else M
    tn = _TN if N >= _TN else N
    m_tiles = pl.cdiv(M, tm)
    n_tiles = pl.cdiv(N, tn)

    in_specs = [
        pl.BlockSpec((tm, K), lambda i, j: (i, 0)),
        pl.BlockSpec((K, tn), lambda i, j: (0, j)),
        pl.BlockSpec((1, tn), lambda i, j: (0, j)),
    ]
    if bn_stats:
        out_shape = (jax.ShapeDtypeStruct((M, N), out_dtype),
                     jax.ShapeDtypeStruct((m_tiles, 2, N), jnp.float32))
        out_specs = (pl.BlockSpec((tm, tn), lambda i, j: (i, j)),
                     pl.BlockSpec((1, 2, tn), lambda i, j: (i, 0, j)))
    else:
        out_shape = jax.ShapeDtypeStruct((M, N), out_dtype)
        out_specs = pl.BlockSpec((tm, tn), lambda i, j: (i, j))

    res = pl.pallas_call(
        functools.partial(_mm_kernel, act=act, bn_stats=bn_stats,
                          m_valid=M, tm=tm),
        out_shape=out_shape,
        grid=(m_tiles, n_tiles),
        in_specs=in_specs,
        out_specs=out_specs,
        compiler_params=pltpu.CompilerParams(
            dimension_semantics=("parallel", "parallel"),
            vmem_limit_bytes=_VMEM_LIMIT),
    )(a, b, bias2)

    if bn_stats:
        y, st = res
        s = st[:, 0, :].sum(axis=0)
        ss = st[:, 1, :].sum(axis=0)
        return y, (s, ss, float(M))
    return res


# ----------------------------------------------------------------------------
# Implicit-im2col 3x3 / stride-1 / pad-1 convolution.
# Padded activation kept flattened (row stride Wp = W + 2) in HBM; the kernel
# DMAs a (tm + 2*Wp + 2)-row window once per M tile and accumulates the 9
# tap matmuls (offset = di*Wp + dj) into an f32 VMEM scratch.
# Output is produced in the padded-W layout (garbage at wo >= W) and compacted
# with a single XLA slice afterwards; BN stats are masked in-kernel.
# ----------------------------------------------------------------------------
def _conv3x3_kernel(a_hbm, w_ref, mask_ref, o_ref, st_ref, abuf, sem, acc_ref,
                    *, tm, ov, wp):
    n = pl.program_id(0)
    i = pl.program_id(1)
    j = pl.program_id(2)

    @pl.when(j == 0)                       # A window is shared across Cout tiles
    def _():
        start = pl.multiple_of(i * tm, 8)
        cp = pltpu.make_async_copy(
            a_hbm.at[n, pl.ds(start, tm + ov), :], abuf, sem)
        cp.start()
        cp.wait()

    acc_ref[...] = jnp.zeros_like(acc_ref)
    for tap in range(9):
        off = (tap // 3) * wp + (tap % 3)
        acc_ref[...] += jnp.dot(abuf[off:off + tm, :], w_ref[tap],
                                preferred_element_type=jnp.float32)
    y = acc_ref[...]
    o_ref[0, :, :] = y.astype(o_ref.dtype)
    # Masked BN partial statistics (mask removes padded-column / padded-row
    # garbage outputs; all A reads are genuine zeros so y is finite).
    ym = y * mask_ref[...]
    st_ref[0, 0, 0, :] = jnp.sum(ym, axis=0)
    st_ref[0, 0, 1, :] = jnp.sum(ym * ym, axis=0)


def conv3x3_s1(x, w):
    N, H, W, Cin = x.shape
    Cout = w.shape[3]
    Wp = W + 2
    m_img = H * Wp
    if m_img <= _TM:
        tm = _round_up(m_img, 8)
        nmb = 1
    else:
        nmb = pl.cdiv(m_img, _TM)
        tm = _round_up(pl.cdiv(m_img, nmb), 8)
        nmb = pl.cdiv(m_img, tm)
    ov = 2 * Wp + 2
    rows_total = nmb * tm + ov

    xp = jnp.pad(x.astype(jnp.bfloat16), ((0, 0), (1, 1), (1, 1), (0, 0)))
    a = xp.reshape(N, (H + 2) * Wp, Cin)
    a = jnp.pad(a, ((0, 0), (0, rows_total - (H + 2) * Wp), (0, 0)))

    w9 = w.astype(jnp.bfloat16).reshape(9, Cin, Cout)

    r = jnp.arange(nmb * tm, dtype=jnp.int32)
    mask = ((r < m_img) & ((r % Wp) < W)).astype(jnp.float32)
    mask = mask.reshape(nmb * tm, 1)

    tn = _TN if Cout >= _TN else Cout
    n_tiles = pl.cdiv(Cout, tn)

    out_shape = (jax.ShapeDtypeStruct((N, nmb * tm, Cout), jnp.bfloat16),
                 jax.ShapeDtypeStruct((N, nmb, 2, Cout), jnp.float32))
    out_specs = (pl.BlockSpec((1, tm, tn), lambda n, i, j: (n, i, j)),
                 pl.BlockSpec((1, 1, 2, tn), lambda n, i, j: (n, i, 0, j)))

    y, st = pl.pallas_call(
        functools.partial(_conv3x3_kernel, tm=tm, ov=ov, wp=Wp),
        out_shape=out_shape,
        grid=(N, nmb, n_tiles),
        in_specs=[
            pl.BlockSpec(memory_space=pl.ANY),                    # activation (HBM)
            pl.BlockSpec((9, Cin, tn), lambda n, i, j: (0, 0, j)),
            pl.BlockSpec((tm, 1), lambda n, i, j: (i, 0)),
        ],
        out_specs=out_specs,
        scratch_shapes=[
            pltpu.VMEM((tm + ov, Cin), jnp.bfloat16),
            pltpu.SemaphoreType.DMA,
            pltpu.VMEM((tm, tn), jnp.float32),
        ],
        compiler_params=pltpu.CompilerParams(
            dimension_semantics=("parallel", "parallel", "arbitrary"),
            vmem_limit_bytes=_VMEM_LIMIT),
    )(a, w9, mask)

    y = y[:, :m_img, :].reshape(N, H, Wp, Cout)[:, :, :W, :]
    s = st[:, :, 0, :].sum(axis=(0, 1))
    ss = st[:, :, 1, :].sum(axis=(0, 1))
    return y, (s, ss, float(N * H * W))


# ----------------------------------------------------------------------------
# BatchNorm apply: row + channel tiled elementwise scale/shift
# (+ optional residual add) (+ optional ReLU).  Stats come from the conv.
# ----------------------------------------------------------------------------
def _scale_shift_kernel(x_ref, s_ref, t_ref, o_ref, *, relu):
    y = x_ref[...].astype(jnp.float32) * s_ref[...] + t_ref[...]
    if relu:
        y = jnp.maximum(y, 0.0)
    o_ref[...] = y.astype(o_ref.dtype)


def _scale_shift_res_kernel(x_ref, r_ref, s_ref, t_ref, o_ref):
    y = x_ref[...].astype(jnp.float32) * s_ref[...] + t_ref[...]
    y = y + r_ref[...].astype(jnp.float32)
    o_ref[...] = jnp.maximum(y, 0.0).astype(o_ref.dtype)


def pallas_scale_shift(x2d, scale, shift, relu=False, residual=None,
                       out_dtype=jnp.bfloat16):
    R, C = x2d.shape
    tr = 512 if R >= 512 else R
    tc = 512 if C >= 512 else C
    grid = (pl.cdiv(R, tr), pl.cdiv(C, tc))
    x_spec = pl.BlockSpec((tr, tc), lambda i, j: (i, j))
    v_spec = pl.BlockSpec((1, tc), lambda i, j: (0, j))
    s2 = scale.astype(jnp.float32).reshape(1, C)
    t2 = shift.astype(jnp.float32).reshape(1, C)
    cp = pltpu.CompilerParams(dimension_semantics=("parallel", "parallel"),
                              vmem_limit_bytes=_VMEM_LIMIT)
    if residual is None:
        return pl.pallas_call(
            functools.partial(_scale_shift_kernel, relu=relu),
            out_shape=jax.ShapeDtypeStruct((R, C), out_dtype),
            grid=grid, in_specs=[x_spec, v_spec, v_spec], out_specs=x_spec,
            compiler_params=cp)(x2d, s2, t2)
    return pl.pallas_call(
        _scale_shift_res_kernel,
        out_shape=jax.ShapeDtypeStruct((R, C), out_dtype),
        grid=grid, in_specs=[x_spec, x_spec, v_spec, v_spec], out_specs=x_spec,
        compiler_params=cp)(x2d, residual, s2, t2)


def bn_apply(y, stats, bn, relu, residual=None, out_dtype=jnp.bfloat16):
    """Training-mode BatchNorm from fused (sum, sumsq, count) statistics."""
    gamma, beta = bn
    s, ss, cnt = stats
    mean = s / cnt
    var = jnp.maximum(ss / cnt - mean * mean, 0.0)
    inv = lax.rsqrt(var + 1e-5)
    scale = gamma * inv
    shift = beta - mean * scale
    shape = y.shape
    C = shape[-1]
    y2 = y.reshape(-1, C)
    res2 = None if residual is None else residual.reshape(-1, C)
    out = pallas_scale_shift(y2, scale, shift, relu=relu, residual=res2,
                             out_dtype=out_dtype)
    return out.reshape(shape)


# ----------------------------------------------------------------------------
# Global average pool (channel-tiled) and L2 normalize
# ----------------------------------------------------------------------------
def _avgpool_kernel(x_ref, o_ref):
    o_ref[...] = jnp.mean(x_ref[...].astype(jnp.float32), axis=1)


def pallas_global_avgpool(x_nhwc):
    # AdaptiveAvgPool2d((1,1)) + flatten  ->  (N, C) in f32
    N, H, W, C = x_nhwc.shape
    x3 = x_nhwc.reshape(N, H * W, C)
    tc = min(512, C)
    return pl.pallas_call(
        _avgpool_kernel,
        out_shape=jax.ShapeDtypeStruct((N, C), jnp.float32),
        grid=(pl.cdiv(C, tc),),
        in_specs=[pl.BlockSpec((N, H * W, tc), lambda j: (0, 0, j))],
        out_specs=pl.BlockSpec((N, tc), lambda j: (0, j)),
        compiler_params=pltpu.CompilerParams(
            dimension_semantics=("parallel",), vmem_limit_bytes=_VMEM_LIMIT),
    )(x3)


def _l2norm_kernel(x_ref, o_ref):
    x = x_ref[...].astype(jnp.float32)
    n = jnp.sqrt(jnp.sum(x * x, axis=-1, keepdims=True))
    o_ref[...] = x / jnp.maximum(n, 1e-12)   # matches F.normalize eps=1e-12


def pallas_l2_normalize(x2d):
    R, C = x2d.shape
    return pl.pallas_call(
        _l2norm_kernel,
        out_shape=jax.ShapeDtypeStruct((R, C), jnp.float32),
        grid=(1,),
        in_specs=[pl.BlockSpec((R, C), lambda i: (0, 0))],
        out_specs=pl.BlockSpec((R, C), lambda i: (0, 0)),
    )(x2d)


# ----------------------------------------------------------------------------
# Convolution glue (every conv returns (y_nhwc_bf16, (sum, sumsq, count)))
# ----------------------------------------------------------------------------
def conv2d(x, w, stride=1, padding=0):
    N, H, W, Cin = x.shape
    KH, KW, Cin2, Cout = w.shape
    assert Cin == Cin2
    if KH == 1 and KW == 1:
        if stride != 1:
            # TODO(synk): fold the stride-2 row/col selection into the matmul
            # index_map instead of this XLA slice (3 small downsample convs).
            x = x[:, ::stride, ::stride, :]
            N, H, W, Cin = x.shape
        y, st = pallas_matmul(x.reshape(N * H * W, Cin), w.reshape(Cin, Cout),
                              out_dtype=jnp.bfloat16, bn_stats=True)
        return y.reshape(N, H, W, Cout), st
    if KH == 3 and KW == 3 and stride == 1 and padding == 1 and Cin >= 64:
        return conv3x3_s1(x, w)
    # Fallback: materialized im2col (only the 3-channel stem and the three
    # stride-2 3x3 convs take this path).
    # TODO(synk): implicit im2col for the stride-2 3x3 convs as well.
    x_b = x.astype(jnp.bfloat16)
    x_p = jnp.pad(x_b, ((0, 0), (padding, padding), (padding, padding), (0, 0)))
    Ho = (H + 2 * padding - KH) // stride + 1
    Wo = (W + 2 * padding - KW) // stride + 1
    patches = []
    for i in range(KH):
        for j in range(KW):
            patches.append(
                x_p[:, i:i + Ho * stride:stride, j:j + Wo * stride:stride, :])
    a = jnp.concatenate(patches, axis=-1).reshape(N * Ho * Wo, KH * KW * Cin)
    y, st = pallas_matmul(a, w.reshape(KH * KW * Cin, Cout),
                          out_dtype=jnp.bfloat16, bn_stats=True)
    return y.reshape(N, Ho, Wo, Cout), st


# ----------------------------------------------------------------------------
# Deterministic parameter initialization (synthetic weights — no checkpoint)
# ----------------------------------------------------------------------------
class _KeyGen:
    def __init__(self, seed):
        self._key = jax.random.PRNGKey(seed)

    def __call__(self):
        self._key, sub = jax.random.split(self._key)
        return sub


def _conv_w(kg, kh, kw, cin, cout):
    return (0.05 * jax.random.normal(kg(), (kh, kw, cin, cout))).astype(jnp.bfloat16)


def _linear_w(kg, din, dout):
    return (0.05 * jax.random.normal(kg(), (din, dout))).astype(jnp.bfloat16)


def _bn_params(c):
    # PyTorch BatchNorm init: weight=1, bias=0
    return (jnp.ones((c,), jnp.float32), jnp.zeros((c,), jnp.float32))


def _make_bottleneck(kg, inplanes, planes, stride):
    p = {
        "conv1": _conv_w(kg, 1, 1, inplanes, planes),
        "bn1": _bn_params(planes),
        "conv2": _conv_w(kg, 3, 3, planes, planes),
        "bn2": _bn_params(planes),
        "conv3": _conv_w(kg, 1, 1, planes, planes * 4),
        "bn3": _bn_params(planes * 4),
        "stride": stride,
    }
    if stride != 1 or inplanes != planes * 4:
        p["down_conv"] = _conv_w(kg, 1, 1, inplanes, planes * 4)
        p["down_bn"] = _bn_params(planes * 4)
    return p


def init_params(seed=0, feature_dim=128, level_number=4):
    kg = _KeyGen(seed)
    params = {
        # replaced stem: Conv2d(3, 64, k=3, s=1, p=1, bias=False)
        "conv1": _conv_w(kg, 3, 3, 3, 64),
        "bn1": _bn_params(64),
        "layers": [],
    }
    inplanes = 64
    for planes, blocks, stride in [(64, 3, 1), (128, 4, 2), (256, 6, 2), (512, 3, 2)]:
        layer = [_make_bottleneck(kg, inplanes, planes, stride)]
        inplanes = planes * 4
        for _ in range(blocks - 1):
            layer.append(_make_bottleneck(kg, inplanes, planes, 1))
        params["layers"].append(layer)
    tree_dim = 2 ** (level_number + 1) - 1 - 2 ** level_number  # 15 for level_number=4
    params["g_w1"] = _linear_w(kg, 2048, 512)                   # bias=False
    params["g_bn"] = _bn_params(512)
    params["g_w2"] = _linear_w(kg, 512, feature_dim)
    params["g_b2"] = (0.05 * jax.random.normal(kg(), (feature_dim,))).astype(jnp.float32)
    params["tree_w"] = _linear_w(kg, 2048, tree_dim)
    params["tree_b"] = (0.05 * jax.random.normal(kg(), (tree_dim,))).astype(jnp.float32)
    return params


# ----------------------------------------------------------------------------
# Forward pass
# ----------------------------------------------------------------------------
def bottleneck_forward(x, p):
    y, st = conv2d(x, p["conv1"], stride=1, padding=0)
    out = bn_apply(y, st, p["bn1"], relu=True)
    y, st = conv2d(out, p["conv2"], stride=p["stride"], padding=1)
    out = bn_apply(y, st, p["bn2"], relu=True)
    y3, st3 = conv2d(out, p["conv3"], stride=1, padding=0)
    if "down_conv" in p:
        yd, std = conv2d(x, p["down_conv"], stride=p["stride"], padding=0)
        identity = bn_apply(yd, std, p["down_bn"], relu=False)
    else:
        identity = x
    # fused: bn3 + residual add + ReLU in a single kernel
    return bn_apply(y3, st3, p["bn3"], relu=True, residual=identity)


def model_forward(params, x_nchw):
    # PyTorch input is NCHW -> NHWC for the kernels; activations kept in bf16
    x = jnp.transpose(x_nchw, (0, 2, 3, 1)).astype(jnp.bfloat16)
    # stem (no MaxPool in this branch)
    y, st = conv2d(x, params["conv1"], stride=1, padding=1)
    x = bn_apply(y, st, params["bn1"], relu=True)
    # layer1..layer4
    for layer in params["layers"]:
        for blk in layer:
            x = bottleneck_forward(x, blk)
    # avgpool + flatten  ->  feature (N, 2048) in f32
    feature = pallas_global_avgpool(x)
    # g head: Linear(2048,512,no bias) -> BN1d -> ReLU -> Linear(512,128,bias)
    h, sth = pallas_matmul(feature, params["g_w1"], out_dtype=jnp.bfloat16,
                           bn_stats=True)
    h = bn_apply(h, sth, params["g_bn"], relu=True)
    out = pallas_matmul(h, params["g_w2"], bias=params["g_b2"],
                        out_dtype=jnp.float32)
    # tree head: Linear(2048,15) -> Sigmoid (fused into the matmul epilogue)
    tree_output = pallas_matmul(feature, params["tree_w"], bias=params["tree_b"],
                                act="sigmoid", out_dtype=jnp.float32)
    return (pallas_l2_normalize(feature), pallas_l2_normalize(out), tree_output)


# TODO(synk): torch.load of the pretrained checkpoint and the unused
# masks_for_level (.cuda()) buffers are not reproducible in-script; weights are
# synthetic deterministic random instead.  BN running-stat updates are not
# modeled (forward output does not depend on them in train mode).

if __name__ == "__main__":
    params = init_params(seed=0, feature_dim=128, level_number=4)
    x = jax.random.normal(jax.random.PRNGKey(0), (2, 3, 16, 16), jnp.float32)  # NCHW
    feat_n, out_n, tree_out = model_forward(params, x)
    jax.block_until_ready((feat_n, out_n, tree_out))
    assert feat_n.shape == (2, 2048)
    assert out_n.shape == (2, 128)
    assert tree_out.shape == (2, 15)
    print("KERNEL_OK")
</pallas_src>

<mosaic_0001>
module attributes {stable_mosaic.version = 11 : i64} {
  func.func @_mm_kernel(%arg0: i32, %arg1: i32, %arg2: memref<256x27xbf16, #tpu.memory_space<vmem>>, %arg3: memref<27x64xbf16, #tpu.memory_space<vmem>>, %arg4: memref<1x64xf32, #tpu.memory_space<vmem>>, %arg5: memref<256x64xbf16, #tpu.memory_space<vmem>>, %arg6: memref<1x2x64xf32, #tpu.memory_space<vmem>>) attributes {dimension_semantics = [#tpu.dimension_semantics<parallel>, #tpu.dimension_semantics<parallel>], iteration_bounds = array<i64: 2, 1>, scalar_prefetch = 0 : i64, scratch_operands = 0 : i64, tpu.core_type = #tpu.core_type<tc>, window_params = [{transform_indices = @transform_0, window_bounds = array<i64: 256, 27>}, {transform_indices = @transform_1, window_bounds = array<i64: 27, 64>}, {transform_indices = @transform_2, window_bounds = array<i64: 1, 64>}, {transform_indices = @transform_3, window_bounds = array<i64: 256, 64>}, {transform_indices = @transform_4, window_bounds = array<i64: 1, 2, 64>}]} {
    %c0 = arith.constant 0 : index
    %c0_0 = arith.constant 0 : index
    %0 = vector.load %arg2[%c0, %c0_0] : memref<256x27xbf16, #tpu.memory_space<vmem>>, vector<256x27xbf16>
    %c0_1 = arith.constant 0 : index
    %c0_2 = arith.constant 0 : index
    %1 = vector.load %arg3[%c0_1, %c0_2] : memref<27x64xbf16, #tpu.memory_space<vmem>>, vector<27x64xbf16>
    %cst = arith.constant dense<0.000000e+00> : vector<256x64xf32>
    %2 = tpu.matmul %0, %1, %cst {dimension_numbers = #tpu.dot_dimension_numbers<[1], [0], [0], [1], [0, 0, 1, 1], [], []>} : vector<256x27xbf16>, vector<27x64xbf16>, vector<256x64xf32> -> vector<256x64xf32>
    %c0_3 = arith.constant 0 : index
    %c0_4 = arith.constant 0 : index
    %3 = vector.load %arg4[%c0_3, %c0_4] : memref<1x64xf32, #tpu.memory_space<vmem>>, vector<1x64xf32>
    %4 = vector.broadcast %3 : vector<1x64xf32> to vector<256x64xf32>
    %5 = arith.addf %2, %4 : vector<256x64xf32>
    %6 = arith.truncf %5 : vector<256x64xf32> to vector<256x64xbf16>
    %c0_5 = arith.constant 0 : index
    %c0_6 = arith.constant 0 : index
    %7 = vector.load %arg5[%c0_5, %c0_6] : memref<256x64xbf16, #tpu.memory_space<vmem>>, vector<256x64xbf16>
    tpu.vector_store %arg5[%c0_5, %c0_6], %6 {strides = array<i32>} : memref<256x64xbf16, #tpu.memory_space<vmem>>, vector<256x64xbf16>,
    %c256_i32 = arith.constant 256 : i32
    %8 = arith.muli %arg0, %c256_i32 : i32
    %9 = tpu.iota {dimensions = array<i32: 0>} : vector<256x1xi32>
    %10 = vector.broadcast %8 : i32 to vector<256x1xi32>
    %11 = arith.addi %10, %9 : vector<256x1xi32>
    %c512_i32 = arith.constant 512 : i32
    %12 = vector.broadcast %c512_i32 : i32 to vector<256x1xi32>
    %13 = arith.cmpi slt, %11, %12 : vector<256x1xi32>
    %cst_7 = arith.constant 0.000000e+00 : f32
    %14 = vector.shape_cast %13 : vector<256x1xi1> to vector<256x1xi1>
    %15 = vector.broadcast %14 : vector<256x1xi1> to vector<256x64xi1>
    %16 = vector.broadcast %cst_7 : f32 to vector<256x64xf32>
    %17 = arith.select %15, %5, %16 : vector<256x64xi1>, vector<256x64xf32>
    %cst_8 = arith.constant dense<0.000000e+00> : vector<64xf32>
    %18 = vector.multi_reduction <add>, %17, %cst_8 [0] : vector<256x64xf32> to vector<64xf32>
    %c0_9 = arith.constant 0 : index
    %c0_10 = arith.constant 0 : index
    %c0_11 = arith.constant 0 : index
    %19 = vector.load %arg6[%c0_9, %c0_10, %c0_11] : memref<1x2x64xf32, #tpu.memory_space<vmem>>, vector<1x1x64xf32>
    %20 = vector.shape_cast %19 : vector<1x1x64xf32> to vector<64xf32>
    %21 = vector.shape_cast %18 : vector<64xf32> to vector<1x1x64xf32>
    tpu.vector_store %arg6[%c0_9, %c0_10, %c0_11], %21 {strides = array<i32>} : memref<1x2x64xf32, #tpu.memory_space<vmem>>, vector<1x1x64xf32>,
    %22 = arith.mulf %17, %17 : vector<256x64xf32>
    %cst_12 = arith.constant dense<0.000000e+00> : vector<64xf32>
    %23 = vector.multi_reduction <add>, %22, %cst_12 [0] : vector<256x64xf32> to vector<64xf32>
    %c0_13 = arith.constant 0 : index
    %c1 = arith.constant 1 : index
    %c0_14 = arith.constant 0 : index
    %24 = vector.load %arg6[%c0_13, %c1, %c0_14] : memref<1x2x64xf32, #tpu.memory_space<vmem>>, vector<1x1x64xf32>
    %25 = vector.shape_cast %24 : vector<1x1x64xf32> to vector<64xf32>
    %26 = vector.shape_cast %23 : vector<64xf32> to vector<1x1x64xf32>
    tpu.vector_store %arg6[%c0_13, %c1, %c0_14], %26 {strides = array<i32>} : memref<1x2x64xf32, #tpu.memory_space<vmem>>, vector<1x1x64xf32>,
    return
  }
  func.func @transform_0(%arg0: i32, %arg1: i32) -> (i32, i32) {
    %c0_i32 = arith.constant 0 : i32
    %c0_i32_0 = arith.constant 0 : i32
    return %arg0, %c0_i32 : i32, i32
  }
  func.func @transform_1(%arg0: i32, %arg1: i32) -> (i32, i32) {
    %c0_i32 = arith.constant 0 : i32
    %c0_i32_0 = arith.constant 0 : i32
    return %c0_i32, %arg1 : i32, i32
  }
  func.func @transform_2(%arg0: i32, %arg1: i32) -> (i32, i32) {
    %c0_i32 = arith.constant 0 : i32
    %c0_i32_0 = arith.constant 0 : i32
    return %c0_i32, %arg1 : i32, i32
  }
  func.func @transform_3(%arg0: i32, %arg1: i32) -> (i32, i32) {
    %c0_i32 = arith.constant 0 : i32
    return %arg0, %arg1 : i32, i32
  }
  func.func @transform_4(%arg0: i32, %arg1: i32) -> (i32, i32, i32) {
    %c0_i32 = arith.constant 0 : i32
    %c0_i32_0 = arith.constant 0 : i32
    return %arg0, %c0_i32, %arg1 : i32, i32, i32
  }
}

</mosaic_0001>

<bundles_post_ra>
// kernel: tpu_custom_call.1
= control target key start
LH: loop header
LB: loop body
LE: loop exit
PB: predicated region body
PF: predicated region fallthrough
CT: control target
= control target key end

     0   :  { %10 = vsyncpa [#allocation3], 0  ;;  %s2040_s0 = inlined_call_operand.vmem [shape: bf16[512,27], index: 0, kind: input, shape index: {}]   ;;  %s2041_s1 = inlined_call_operand.vmem [shape: bf16[27,64], index: 1, kind: input, shape index: {}]   ;;  %s2042_s2 = inlined_call_operand.vmem [shape: f32[1,64], index: 2, kind: input, shape index: {}]   ;;  %s2043_s3 = inlined_call_operand.vmem [shape: bf16[512,64], index: 3, kind: output, shape index: {0}]   ;;  %s2044_s4 = inlined_call_operand.hbm [shape: f32[2,2,64], index: 4, kind: output, shape index: {1}]  }
   0x1   :  { %12 = vsyncpa [#allocation3 + $0x1], 0  ;;  %s1424_s15 = smov 0   ;;  %s1426_s16 = smov 0  }
   0x2   :  { %s1428_s17 = smov 0   ;;  %s1430_s18 = smov 0  }
   0x3   :  { %s1432_s19 = smov 0   ;;  %s1434_s20 = smov 0  }
   0x4 LB: > { %s1132_s21 = sadd.s32 4294967295, %s1396_s20   ;;  %s1133_s22 = sadd.s32 4294967294, %s1396_s20   ;;  %s1396_s20 = sphi %s1434_s20, %s18_s20   ;;  %s1392_s19 = sphi %s1432_s19, %s2051_s19   ;;  %s1388_s18 = sphi %s1430_s18, %s2050_s18   ;;  %s1384_s17 = sphi %s1428_s17, %s2049_s17   ;;  %s1380_s16 = sphi %s1426_s16, %s2048_s16   ;;  %s1376_s15 = sphi %s1424_s15, %s2047_s15  }
   0x5   : > { %s30_s23 = sadd.s32 1, %s1392_s19  ;;  %s145_s24 = sadd.s32 1, %s1384_s17 }
   0x6   : > { %p32_p0 = scmp.ge.s32.totalorder %s30_s23, 2  ;;  %p155_p1 = scmp.ne.s32.totalorder %s1384_s17, %s1380_s16 }
   0x7   : > { %p156_p2 = scmp.eq.s32.totalorder %s1132_s21, 1  ;;  %p161_p3 = scmp.ne.s32.totalorder %s1380_s16, %s1376_s15 }
   0x8   : > { %s2053_s23 = smov (%p32_p0, %s30_s23), 0  ;;  %p162_p5 = scmp.eq.s32.totalorder %s1133_s22, 1 }
   0x9   : > { %p1464_p4 = por %p156_p2, %p155_p1  ;;  %s140_s26 = ssub.s32 %s1392_s19, %s2053_s23 }
   0xa   : > { %p1138_p6 = scmp.ge.s32.totalorder %s1396_s20, 1  ;;  %p143_p7 = scmp.eq.s32.totalorder %s140_s26, 0 }
   0xb   : > { %p1471_p8 = por %p162_p5, %p161_p3  ;;  %p202_p9 = scmp.lt.s32.totalorder %s1396_s20, 3 }
   0xc   : > { %s1477_s28 = scalar_select %p143_p7, %s1384_s17, %s145_s24  }
   0xd   : > { %p203_p10 = pnand %p1138_p6, %p202_p9 }
   0xe   : > { %s1140_s7 = sshll.u32 (!%p203_p10), %s1388_s18, 5  ;;  %s1232_s29 = sshll.u32 (!%p203_p10), %s1388_s18, 8 }
   0xf   : > { %206 = sbr.rel (%p203_p10) target bundleno = 286 (0x11e), region = 32  ;;  %p244_p11 = scmp.lt.s32.totalorder (!%p203_p10), %s1140_s7, 63 }
  0x10   : > { %s240_s30 = sand.u32 (!%p203_p10), 1, %s1380_s16   ;;  %s1234_s6 = sshll.u32 (!%p203_p10), %s1388_s18, 1 }
  0x11   : > { %s1139_s5 = sshll.u32 (!%p203_p10), %s240_s30, 1  ;;  %s1000_s9 = scalar_lea.hbm (!%p203_p10), %s2044_s4, %s1234_s6 }
  0x12   : > { %s1004_s12 = sshll.u32 (!%p203_p10), %s1000_s9, 4  ;;  %s985_s18 = scalar_lea.sflag (!%p203_p10), [#allocation3], %s240_s30  ;;  %s1005_s12 = int_to_ptr.hbm [resolvable:$true] %s1004_s12 }
  0x13   : > { %s1338_s24 = scalar_lea.hbm (!%p203_p10), %s2044_s4, 4 }
  0x14   : > { %v1214_v0 = vld [vmem:[%s2041_s1 + $0x8] sm:$0xf]  ;;  %v1254_v1 = vld [vmem:[%s2041_s1 + $0x8] sm:$0x30]  ;;  %vm446_vm0 = vcmask 1044480   ;;  %vm447_vm1 = vcmask 1045504   ;;  %v608_v41 = vlaneseq  ;;  %v1606_v56 = vstv %s1232_s29 }
  0x15   : > { %v1215_v2 = vor.u32 %v1254_v1, %v1214_v0  ;;  %v1398_v3 = vmov 65535   ;;  %s2055_s7 = smov (!%p244_p11, %s1140_s7), 63  ;;  %v1253_v7 = vld [vmem:[%s2041_s1] sm:$0xff]  ;;  %vm397_vm2 = vcmask 220160   ;;  %vm574_vm3 = vcmask 519168  }
  0x16   : > { %v448_v4 = vsel %vm446_vm0, 4294967295, %v1398_v3  ;;  %s1141_s10 = sshll.u32 %s2055_s7, 2  ;;  %v1534_v24 = vld [vmem:[%s2042_s2] ss:$0 sm:$0xff]  ;;  %v1593_v51 = vshrl.u32 %v608_v41, 7  ;;  %vm802_vm6 = vcmask 523264  }
  0x17   : > { %v449_v5 = vsel %vm447_vm1, %v448_v4, 0  ;;  %s1497_s13 = scalar_lea.vmem %s2040_s0, %s1141_s10  ;;  %s1547_s26 = scalar_lea.vmem %s2043_s3, %s1141_s10 }
  0x18   : > { %v451_v6 = vand.u32 %v1215_v2, %v449_v5  ;;  %v1237_v8 = vld [vmem:[%s1497_s13] sm:$0xff]  ;;  %v1238_v12 = vld [vmem:[%s1497_s13 + $0x8] sm:$0xff]  ;;  %v1239_v16 = vld [vmem:[%s1497_s13 + $0x10] sm:$0xff]  ;;  %v617_v55 = vadd.s32 64, %v1593_v51  ;;  %v610_v57 = vadd.s32 8, %v1593_v51  ;;  %v642_v59 = vadd.s32 %v1606_v56, %v1593_v51  ;;  %s242_s10 = scalar_lea.vmem [#allocation2], %s1139_s5 }
  0x19   : > { %v1241_v9 = vld [vmem:[%s1497_s13 + $0x20] sm:$0xff]  ;;  %v1242_v13 = vld [vmem:[%s1497_s13 + $0x28] sm:$0xff]  ;;  %v1243_v17 = vld [vmem:[%s1497_s13 + $0x30] sm:$0xff]  ;;  %v611_v4 = vadd.s32 16, %v1593_v51  ;;  %v618_v5 = vadd.s32 72, %v1593_v51  ;;  %s1002_s11 = sshll.u32 %s242_s10, 4  ;;  %s1003_s11 = int_to_ptr.vmem [resolvable:$true] %s1002_s11 }
  0x1a   : > { %459 = vmatpush.bf16.msra.mxu0 %v451_v6  ;;  %1255 = vmatpush.bf16.msra.mxu1 %v451_v6  ;;  %v1245_v10 = vld [vmem:[%s1497_s13 + $0x40] sm:$0xff]  ;;  %v1246_v14 = vld [vmem:[%s1497_s13 + $0x48] sm:$0xff]  ;;  %v1247_v18 = vld [vmem:[%s1497_s13 + $0x50] sm:$0xff]  ;;  %v650_v60 = vadd.s32 %v1606_v56, %v617_v55  ;;  %v643_v0 = vadd.s32 %v1606_v56, %v610_v57  ;;  %vm674_vm4 = vcmp.lt.s32.totalorder %v642_v59, 512 }
  0x1b   : > { %1256 = vmatpush.bf16.msra.mxu2 %v451_v6  ;;  %1257 = vmatpush.bf16.msra.mxu3 %v451_v6  ;;  %v1249_v11 = vld [vmem:[%s1497_s13 + $0x60] sm:$0xff]  ;;  %v1250_v15 = vld [vmem:[%s1497_s13 + $0x68] sm:$0xff]  ;;  %v1251_v19 = vld [vmem:[%s1497_s13 + $0x70] sm:$0xff] }
  0x1c   : > { %v1240_v20 = vld [vmem:[%s1497_s13 + $0x18] sm:$0xff]  ;;  %vm682_vm5 = vcmp.lt.s32.totalorder %v650_v60, 512  ;;  %vm675_vm7 = vcmp.lt.s32.totalorder %v643_v0, 512 }
  0x1d   : > { %v1244_v21 = vld [vmem:[%s1497_s13 + $0x38] sm:$0xff] }
  0x1e   : > { %460 = vmatpush.bf16.msra.mxu0 %v1253_v7  ;;  %1258 = vmatpush.bf16.msra.mxu1 %v1253_v7  ;;  %v1248_v22 = vld [vmem:[%s1497_s13 + $0x58] sm:$0xff] }
  0x1f   : > { %1259 = vmatpush.bf16.msra.mxu2 %v1253_v7  ;;  %1260 = vmatpush.bf16.msra.mxu3 %v1253_v7  ;;  %v1252_v23 = vld [vmem:[%s1497_s13 + $0x78] sm:$0xff]  ;;  %s1332_s13 = sshra.s32 %s1005_s12, 4  ;;  %s1333_s13 = int_to_ptr.hbm [resolvable:$true] %s1332_s13 }
  0x20   : > { %s1334_s14 = scalar_lea.hbm %s1333_s13, 2  ;;  %p1339_p1 = scmp.lt.s32.totalorder %s1333_s13, %s2044_s4 }
  0x21   : > { %1216 = vmatmul.msk.bf16.vlgmr.msra.gmra.mxu0 %vm397_vm2, %v1237_v8  ;;  %1220 = vmatmul.msk.bf16.vlgmr.msra.gmra.mxu1 %vm397_vm2, %v1241_v9  ;;  %v612_v9 = vadd.s32 24, %v1593_v51  ;;  %p1335_p12 = scmp.ne.s32.totalorder %s1333_s13, %s1334_s14  ;;  %p1340_p2 = scmp.lt.s32.totalorder %s1338_s24, %s1334_s14 }
  0x22   : > { %1224 = vmatmul.msk.bf16.vlgmr.msra.gmra.mxu2 %vm397_vm2, %v1245_v10  ;;  %1228 = vmatmul.msk.bf16.vlgmr.msra.gmra.mxu3 %vm397_vm2, %v1249_v11  ;;  %v625_v11 = vadd.s32 128, %v1593_v51 }
  0x23   : > { %p1336_p13 = pnand %p1335_p12, %p1464_p4  ;;  %p1341_p3 = por %p1340_p2, %p1339_p1 }
  0x25   : > { %p1337_p0 = pneg %p1336_p13 }
  0x27   : > { %p1342_p5 = pnand %p1341_p3, %p1337_p0 }
  0x31   : > { %1217 = vmatmul.msk.bf16.gmra.mxu0 %vm397_vm2, %v1238_v12  ;;  %1221 = vmatmul.msk.bf16.gmra.mxu1 %vm397_vm2, %v1242_v13  ;;  %v613_v12 = vadd.s32 32, %v1593_v51  ;;  %v644_v13 = vadd.s32 %v1606_v56, %v611_v4 }
  0x32   : > { %1225 = vmatmul.msk.bf16.gmra.mxu2 %vm397_vm2, %v1246_v14  ;;  %1229 = vmatmul.msk.bf16.gmra.mxu3 %vm397_vm2, %v1250_v15  ;;  %v651_v14 = vadd.s32 %v1606_v56, %v618_v5 }
  0x33   : > { %vm676_vm9 = vcmp.lt.s32.totalorder %v644_v13, 512 }
  0x34   : > { %vm683_vm8 = vcmp.lt.s32.totalorder %v651_v14, 512 }
  0x41   : > { %1218 = vmatmul.msk.bf16.gmra.mxu0 %vm397_vm2, %v1239_v16  ;;  %1222 = vmatmul.msk.bf16.gmra.mxu1 %vm397_vm2, %v1243_v17 }
  0x42   : > { %1226 = vmatmul.msk.bf16.gmra.mxu2 %vm397_vm2, %v1247_v18  ;;  %1230 = vmatmul.msk.bf16.gmra.mxu3 %vm397_vm2, %v1251_v19  ;;  %v645_v18 = vadd.s32 %v1606_v56, %v612_v9  ;;  %v614_v19 = vadd.s32 40, %v1593_v51 }
  0x44   : > { %v647_v41 = vadd.s32 %v1606_v56, %v614_v19  ;;  %vm677_vm10 = vcmp.lt.s32.totalorder %v645_v18, 512 }
  0x46   : > { %vm679_vm13 = vcmp.lt.s32.totalorder %v647_v41, 512 }
  0x51   : > { %1219 = vmatmul.msk.bf16.gmra.mxu0 %vm397_vm2, %v1240_v20  ;;  %1223 = vmatmul.msk.bf16.gmra.mxu1 %vm397_vm2, %v1244_v21  ;;  %v619_v21 = vadd.s32 80, %v1593_v51 }
  0x52   : > { %1227 = vmatmul.msk.bf16.gmra.mxu2 %vm397_vm2, %v1248_v22  ;;  %1231 = vmatmul.msk.bf16.gmra.mxu3 %vm397_vm2, %v1252_v23  ;;  %v658_v22 = vadd.s32 %v1606_v56, %v625_v11 }
  0x54   : > { %vm690_vm11 = vcmp.lt.s32.totalorder %v658_v22, 512 }
  0x9e   : > { %v462_v25 = vpop.f32.mrf.mxu0  ;;  %v482_v26 = vpop.f32.mrf.mxu1 }
  0x9f   : > { %v1537_v27 = vadd.f32 %v1534_v24, %v462_v25  ;;  %v1540_v28 = vadd.f32 %v1534_v24, %v482_v26  ;;  %v620_v25 = vadd.s32 88, %v1593_v51 }
  0xa1   : > { %v542_v29 = vpack.c.bf16 %v1537_v27, %v1537_v27  ;;  %v550_v30 = vpack.c.bf16 %v1540_v28, %v1540_v28  ;;  %v770_v16 = vsel %vm674_vm4, %v1537_v27, 0.0  ;;  %v778_v17 = vsel %vm682_vm5, %v1540_v28, 0.0 }
  0xa2   : > { %v1668_v28 = vadd.s32 %v1606_v56, %v613_v12 }
  0xa3   : > { %575 = vst.msk [vmem:[%s1547_s26] sm:$0xf] %vm574_vm3, %v542_v29 }
  0xa4   : > { %583 = vst.msk [vmem:[%s1547_s26 + $0x20] sm:$0xf] %vm574_vm3, %v550_v30  ;;  %v626_v30 = vadd.s32 136, %v1593_v51  ;;  %vm678_vm12 = vcmp.lt.s32.totalorder %v1668_v28, 512 }
  0xa5   : > { %v502_v31 = vpop.f32.mrf.mxu2  ;;  %v522_v37 = vpop.f32.mrf.mxu3 }
  0xa6   : > { %v464_v32 = vpop.f32.mrf.mxu0  ;;  %v484_v33 = vpop.f32.mrf.mxu1  ;;  %v1558_v34 = vadd.f32 %v1534_v24, %v502_v31  ;;  %v1579_v43 = vadd.f32 %v1534_v24, %v522_v37  ;;  %v882_v37 = vmul.f32 %v778_v17, %v778_v17 }
  0xa7   : > { %v1561_v35 = vadd.f32 %v1534_v24, %v464_v32  ;;  %v1564_v36 = vadd.f32 %v1534_v24, %v484_v33  ;;  %v874_v33 = vmul.f32 %v770_v16, %v770_v16 }
  0xa8   : > { %v558_v38 = vpack.c.bf16 %v1558_v34, %v1558_v34  ;;  %v566_v49 = vpack.c.bf16 %v1579_v43, %v1579_v43  ;;  %v1709_v55 = vsel %vm802_vm6, %v882_v37, 0.0  ;;  %v786_v57 = vsel %vm690_vm11, %v1558_v34, 0.0 }
  0xa9   : > { %v543_v39 = vpack.c.bf16 %v1561_v35, %v1561_v35  ;;  %v551_v40 = vpack.c.bf16 %v1564_v36, %v1564_v36 }
  0xaa   : > { %591 = vst.msk [vmem:[%s1547_s26 + $0x40] sm:$0xf] %vm574_vm3, %v558_v38 }
  0xab   : > { %576 = vst.msk [vmem:[%s1547_s26 + $0x4] sm:$0xf] %vm574_vm3, %v543_v39  ;;  %v771_v39 = vsel %vm675_vm7, %v1561_v35, 0.0  ;;  %v1694_v35 = vadd.s32 %v1606_v56, %v620_v25 }
  0xac   : > { %584 = vst.msk [vmem:[%s1547_s26 + $0x24] sm:$0xf] %vm574_vm3, %v551_v40  ;;  %v804_v59 = vsel %vm802_vm6, %v771_v39, 0.0 }
  0xad   : > { %v504_v42 = vpop.f32.mrf.mxu2  ;;  %v524_v50 = vpop.f32.mrf.mxu3  ;;  %599 = vst.msk [vmem:[%s1547_s26 + $0x60] sm:$0xf] %vm574_vm3, %v566_v49  ;;  %v803_v49 = vsel %vm802_vm6, %v770_v16, 0.0  ;;  %vm685_vm1 = vcmp.lt.s32.totalorder %v1694_v35, 512 }
  0xae   : > { %v467_v44 = vpop.f32.mrf.mxu0  ;;  %v487_v45 = vpop.f32.mrf.mxu1  ;;  %v1582_v46 = vadd.f32 %v1534_v24, %v504_v42  ;;  %v1633_v7 = vadd.f32 %v1534_v24, %v524_v50  ;;  %v875_v50 = vmul.f32 %v771_v39, %v771_v39 }
  0xaf   : > { %v1585_v47 = vadd.f32 %v1534_v24, %v467_v44  ;;  %v1588_v48 = vadd.f32 %v1534_v24, %v487_v45  ;;  %v1688_v44 = vadd.s32 %v1606_v56, %v619_v21  ;;  %v1697_v45 = vadd.s32 %v1606_v56, %v626_v30 }
  0xb0   : > { %v559_v52 = vpack.c.bf16 %v1582_v46, %v1582_v46  ;;  %v567_v15 = vpack.c.bf16 %v1633_v7, %v1633_v7  ;;  %v907_v9 = vsel %vm802_vm6, %v875_v50, 0.0  ;;  %v627_v21 = vadd.s32 144, %v1593_v51 }
  0xb1   : > { %v544_v53 = vpack.c.bf16 %v1585_v47, %v1585_v47  ;;  %v552_v54 = vpack.c.bf16 %v1588_v48, %v1588_v48  ;;  %v772_v4 = vsel %vm676_vm9, %v1585_v47, 0.0  ;;  %vm691_vm14 = vcmp.lt.s32.totalorder %v1697_v45, 512 }
  0xb2   : > { %592 = vst.msk [vmem:[%s1547_s26 + $0x44] sm:$0xf] %vm574_vm3, %v559_v52  ;;  %v1701_v52 = vsel %vm802_vm6, %v778_v17, 0.0  ;;  %v806_v16 = vsel %vm802_vm6, %v772_v4, 0.0  ;;  %v876_v17 = vmul.f32 %v772_v4, %v772_v4  ;;  %vm684_vm15 = vcmp.lt.s32.totalorder %v1688_v44, 512 }
  0xb3   : > { %577 = vst.msk [vmem:[%s1547_s26 + $0x8] sm:$0xf] %vm574_vm3, %v544_v53  ;;  %v779_v53 = vsel %vm683_vm8, %v1564_v36, 0.0 }
  0xb4   : > { %585 = vst.msk [vmem:[%s1547_s26 + $0x28] sm:$0xf] %vm574_vm3, %v552_v54  ;;  %v906_v54 = vsel %vm802_vm6, %v874_v33, 0.0  ;;  %v883_v5 = vmul.f32 %v779_v53, %v779_v53 }
  0xb5   : > { %v507_v58 = vpop.f32.mrf.mxu2  ;;  %v1626_v3 = vpop.f32.mrf.mxu3  ;;  %600 = vst.msk [vmem:[%s1547_s26 + $0x64] sm:$0xf] %vm574_vm3, %v567_v15  ;;  %v805_v15 = vadd.f32 %v804_v59, %v803_v49  ;;  %v908_v22 = vadd.f32 %v907_v9, %v906_v54 }
  0xb6   : > { %v469_v61 = vpop.f32.mrf.mxu0  ;;  %v489_v62 = vpop.f32.mrf.mxu1  ;;  %v1617_v63 = vadd.f32 %v1534_v24, %v507_v58  ;;  %v1719_v36 = vadd.f32 %v1534_v24, %v1626_v3  ;;  %v621_v3 = vadd.s32 96, %v1593_v51  ;;  %v1748_v18 = vsel %vm802_vm6, %v883_v5, 0.0 }
  0xb7   : > { %v1621_v1 = vadd.f32 %v1534_v24, %v469_v61  ;;  %v1624_v2 = vadd.f32 %v1534_v24, %v489_v62  ;;  %v615_v61 = vadd.s32 48, %v1593_v51  ;;  %v807_v30 = vadd.f32 %v806_v16, %v805_v15 }
  0xb8   : > { %v560_v6 = vpack.c.bf16 %v1617_v63, %v1617_v63  ;;  %v568_v14 = vpack.c.bf16 %v1719_v36, %v1719_v36  ;;  %v1765_v37 = vadd.s32 %v1606_v56, %v621_v3 }
  0xb9   : > { %v545_v8 = vpack.c.bf16 %v1621_v1, %v1621_v1  ;;  %v553_v10 = vpack.c.bf16 %v1624_v2, %v1624_v2  ;;  %v773_v11 = vsel %vm677_vm10, %v1621_v1, 0.0  ;;  %v648_v19 = vadd.s32 %v1606_v56, %v615_v61 }
  0xba   : > { %593 = vst.msk [vmem:[%s1547_s26 + $0x48] sm:$0xf] %vm574_vm3, %v560_v6  ;;  %v1751_v1 = vsel %vm802_vm6, %v786_v57, 0.0  ;;  %v808_v49 = vsel %vm802_vm6, %v773_v11, 0.0  ;;  %vm686_vm2 = vcmp.lt.s32.totalorder %v1765_v37, 512 }
  0xbb   : > { %578 = vst.msk [vmem:[%s1547_s26 + $0xc] sm:$0xf] %vm574_vm3, %v545_v8  ;;  %vm680_vm0 = vcmp.lt.s32.totalorder %v648_v19, 512 }
  0xbc   : > { %586 = vst.msk [vmem:[%s1547_s26 + $0x2c] sm:$0xf] %vm574_vm3, %v553_v10  ;;  %v1731_v10 = vsel %vm802_vm6, %v779_v53, 0.0 }
  0xbd   : > { %v509_v20 = vpop.f32.mrf.mxu2  ;;  %v1674_v32 = vpop.f32.mrf.mxu3  ;;  %601 = vst.msk [vmem:[%s1547_s26 + $0x68] sm:$0xf] %vm574_vm3, %v568_v14 }
  0xbe   : > { %v472_v23 = vpop.f32.mrf.mxu0  ;;  %v492_v26 = vpop.f32.mrf.mxu1  ;;  %v1660_v29 = vadd.f32 %v1534_v24, %v509_v20  ;;  %v890_v20 = vmul.f32 %v786_v57, %v786_v57  ;;  %v1776_v41 = vadd.f32 %v1534_v24, %v1674_v32 }
  0xbf   : > { %v1665_v27 = vadd.f32 %v1534_v24, %v472_v23  ;;  %v1672_v31 = vadd.f32 %v1534_v24, %v492_v26  ;;  %v877_v23 = vmul.f32 %v773_v11, %v773_v11  ;;  %v616_v26 = vadd.s32 56, %v1593_v51 }
  0xc0   : > { %v561_v38 = vpack.c.bf16 %v1660_v29, %v1660_v29  ;;  %v569_v5 = vpack.c.bf16 %v1776_v41, %v1776_v41  ;;  %v1795_v9 = vsel %vm802_vm6, %v890_v20, 0.0  ;;  %v809_v11 = vadd.f32 %v808_v49, %v807_v30 }
  0xc1   : > { %v546_v40 = vpack.c.bf16 %v1665_v27, %v1665_v27  ;;  %v554_v42 = vpack.c.bf16 %v1672_v31, %v1672_v31  ;;  %v774_v25 = vsel %vm678_vm12, %v1665_v27, 0.0  ;;  %v649_v32 = vadd.s32 %v1606_v56, %v616_v26 }
  0xc2   : > { %594 = vst.msk [vmem:[%s1547_s26 + $0x4c] sm:$0xf] %vm574_vm3, %v561_v38  ;;  %v633_v38 = vadd.s32 192, %v1593_v51  ;;  %v878_v50 = vmul.f32 %v774_v25, %v774_v25  ;;  %v810_v3 = vsel %vm802_vm6, %v774_v25, 0.0  ;;  %v622_v20 = vadd.s32 104, %v1593_v51 }
  0xc3   : > { %579 = vst.msk [vmem:[%s1547_s26 + $0x10] sm:$0xf] %vm574_vm3, %v546_v40  ;;  %v909_v40 = vsel %vm802_vm6, %v876_v17, 0.0  ;;  %v811_v45 = vadd.f32 %v810_v3, %v809_v11  ;;  %vm681_vm4 = vcmp.lt.s32.totalorder %v649_v32, 512  ;;  %v781_v32 = vsel %vm685_vm1, %v1624_v2, 0.0 }
  0xc4   : > { %587 = vst.msk [vmem:[%s1547_s26 + $0x30] sm:$0xf] %vm574_vm3, %v554_v42  ;;  %v1810_v14 = vadd.s32 %v1606_v56, %v633_v38 }
  0xc5   : > { %v512_v58 = vpop.f32.mrf.mxu2  ;;  %v1727_v8 = vpop.f32.mrf.mxu3  ;;  %602 = vst.msk [vmem:[%s1547_s26 + $0x6c] sm:$0xf] %vm574_vm3, %v569_v5 }
  0xc6   : > { %v474_v60 = vpop.f32.mrf.mxu0  ;;  %v494_v62 = vpop.f32.mrf.mxu1  ;;  %v1715_v0 = vadd.f32 %v1534_v24, %v512_v58  ;;  %v911_v58 = vsel %vm802_vm6, %v877_v23, 0.0  ;;  %v1820_v19 = vadd.f32 %v1534_v24, %v1727_v8  ;;  %vm698_vm8 = vcmp.lt.s32.totalorder %v1810_v14, 512 }
  0xc7   : > { %v475_v34 = vadd.f32 %v1534_v24, %v474_v60  ;;  %v1725_v6 = vadd.f32 %v1534_v24, %v494_v62  ;;  %v635_v14 = vadd.s32 208, %v1593_v51 }
  0xc8   : > { %v562_v47 = vpack.c.bf16 %v1715_v0, %v1715_v0  ;;  %v570_v8 = vpack.c.bf16 %v1820_v19, %v1820_v19 }
  0xc9   : > { %v547_v12 = vpack.c.bf16 %v475_v34, %v475_v34  ;;  %v555_v13 = vpack.c.bf16 %v1725_v6, %v1725_v6  ;;  %v775_v33 = vsel %vm679_vm13, %v475_v34, 0.0  ;;  %v910_v34 = vadd.f32 %v909_v40, %v908_v22 }
  0xca   : > { %595 = vst.msk [vmem:[%s1547_s26 + $0x50] sm:$0xf] %vm574_vm3, %v562_v47  ;;  %v879_v59 = vmul.f32 %v775_v33, %v775_v33  ;;  %v1799_v47 = vadd.s32 %v1606_v56, %v627_v21  ;;  %v812_v16 = vsel %vm802_vm6, %v775_v33, 0.0  ;;  %v780_v33 = vsel %vm684_vm15, %v1588_v48, 0.0 }
  0xcb   : > { %580 = vst.msk [vmem:[%s1547_s26 + $0x14] sm:$0xf] %vm574_vm3, %v547_v12  ;;  %v913_v12 = vsel %vm802_vm6, %v878_v50, 0.0  ;;  %v912_v15 = vadd.f32 %v911_v58, %v910_v34  ;;  %v813_v38 = vadd.f32 %v812_v16, %v811_v45  ;;  %v623_v50 = vadd.s32 112, %v1593_v51 }
  0xcc   : > { %588 = vst.msk [vmem:[%s1547_s26 + $0x34] sm:$0xf] %vm574_vm3, %v555_v13  ;;  %v1807_v13 = vsel %vm691_vm14, %v1582_v46, 0.0  ;;  %v915_v46 = vsel %vm802_vm6, %v879_v59, 0.0  ;;  %v822_v5 = vsel %vm802_vm6, %v780_v33, 0.0  ;;  %v884_v11 = vmul.f32 %v780_v33, %v780_v33 }
  0xcd   : > { %v514_v39 = vpop.f32.mrf.mxu2  ;;  %v1783_v57 = vpop.f32.mrf.mxu3  ;;  %v914_v22 = vadd.f32 %v913_v12, %v912_v15  ;;  %603 = vst.msk [vmem:[%s1547_s26 + $0x70] sm:$0xf] %vm574_vm3, %v570_v8  ;;  %vm692_vm5 = vcmp.lt.s32.totalorder %v1799_v47, 512  ;;  %v628_v12 = vadd.s32 152, %v1593_v51  ;;  %v656_v16 = vadd.s32 %v1606_v56, %v623_v50 }
  0xce   : > { %v477_v42 = vpop.f32.mrf.mxu0  ;;  %v497_v27 = vpop.f32.mrf.mxu1  ;;  %v1772_v28 = vadd.f32 %v1534_v24, %v514_v39 }
  0xcf   : > { %v478_v53 = vadd.f32 %v1534_v24, %v477_v42  ;;  %v1781_v54 = vadd.f32 %v1534_v24, %v497_v27  ;;  %v916_v27 = vadd.f32 %v915_v46, %v914_v22  ;;  %v1872_v46 = vadd.f32 %v1534_v24, %v1783_v57 }
  0xd0   : > { %v563_v60 = vpack.c.bf16 %v1772_v28, %v1772_v28  ;;  %v661_v8 = vadd.s32 %v1606_v56, %v628_v12  ;;  %vm688_vm9 = vcmp.lt.s32.totalorder %v656_v16, 512  ;;  %v631_v16 = vadd.s32 176, %v1593_v51 }
  0xd1   : > { %v548_v61 = vpack.c.bf16 %v478_v53, %v478_v53  ;;  %v776_v62 = vsel %vm680_vm0, %v478_v53, 0.0  ;;  %v556_v4 = vpack.c.bf16 %v1781_v54, %v1781_v54  ;;  %v571_v57 = vpack.c.bf16 %v1872_v46, %v1872_v46 }
  0xd2   : > { %596 = vst.msk [vmem:[%s1547_s26 + $0x54] sm:$0xf] %vm574_vm3, %v563_v60  ;;  %v880_v17 = vmul.f32 %v776_v62, %v776_v62  ;;  %v814_v23 = vsel %vm802_vm6, %v776_v62, 0.0  ;;  %v655_v60 = vadd.s32 %v1606_v56, %v622_v20  ;;  %v885_v20 = vmul.f32 %v781_v32, %v781_v32 }
  0xd3   : > { %581 = vst.msk [vmem:[%s1547_s26 + $0x18] sm:$0xf] %vm574_vm3, %v548_v61  ;;  %v815_v48 = vadd.f32 %v814_v23, %v813_v38  ;;  %v782_v23 = vsel %vm686_vm2, %v1672_v31, 0.0  ;;  %v824_v31 = vsel %vm802_vm6, %v781_v32, 0.0  ;;  %vm693_vm11 = vcmp.lt.s32.totalorder %v661_v8, 512 }
  0xd4   : > { %589 = vst.msk [vmem:[%s1547_s26 + $0x38] sm:$0xf] %vm574_vm3, %v556_v4  ;;  %v917_v49 = vsel %vm802_vm6, %v880_v17, 0.0  ;;  %v624_v4 = vadd.s32 120, %v1593_v51  ;;  %v1867_v17 = vsel %vm802_vm6, %v1807_v13, 0.0  ;;  %vm687_vm7 = vcmp.lt.s32.totalorder %v655_v60, 512 }
  0xd5   : > { %v517_v21 = vpop.f32.mrf.mxu2  ;;  %v537_v42 = vpop.f32.mrf.mxu3  ;;  %v918_v34 = vadd.f32 %v917_v49, %v916_v27  ;;  %604 = vst.msk [vmem:[%s1547_s26 + $0x74] sm:$0xf] %vm574_vm3, %v571_v57  ;;  %v886_v27 = vmul.f32 %v782_v23, %v782_v23  ;;  %v664_v8 = vadd.s32 %v1606_v56, %v631_v16 }
  0xd6   : > { %v479_v25 = vpop.f32.mrf.mxu0  ;;  %v499_v26 = vpop.f32.mrf.mxu1  ;;  %v1828_v30 = vadd.f32 %v1534_v24, %v517_v21  ;;  %v657_v21 = vadd.s32 %v1606_v56, %v624_v4  ;;  %v1899_v49 = vadd.f32 %v1534_v24, %v537_v42 }
  0xd7   : > { %v480_v39 = vadd.f32 %v1534_v24, %v479_v25  ;;  %v1837_v40 = vadd.f32 %v1534_v24, %v499_v26  ;;  %v925_v26 = vsel %vm802_vm6, %v884_v11, 0.0  ;;  %vm696_vm13 = vcmp.lt.s32.totalorder %v664_v8, 512 }
  0xd8   : > { %v564_v53 = vpack.c.bf16 %v1828_v30, %v1828_v30  ;;  %vm689_vm10 = vcmp.lt.s32.totalorder %v657_v21, 512  ;;  %v632_v21 = vadd.s32 184, %v1593_v51 }
  0xd9   : > { %v549_v44 = vpack.c.bf16 %v480_v39, %v480_v39  ;;  %v777_v58 = vsel %vm681_vm4, %v480_v39, 0.0  ;;  %v557_v59 = vpack.c.bf16 %v1837_v40, %v1837_v40  ;;  %v927_v39 = vsel %vm802_vm6, %v885_v20, 0.0 }
  0xda   : > { %v816_v61 = vsel %vm802_vm6, %v777_v58, 0.0  ;;  %v881_v62 = vmul.f32 %v777_v58, %v777_v58  ;;  %597 = vst.msk [vmem:[%s1547_s26 + $0x58] sm:$0xf] %vm574_vm3, %v564_v53  ;;  %v784_v53 = vsel %vm688_vm9, %v1781_v54, 0.0  ;;  %v572_v58 = vpack.c.bf16 %v1899_v49, %v1899_v49 }
  0xdb   : > { %582 = vst.msk [vmem:[%s1547_s26 + $0x1c] sm:$0xf] %vm574_vm3, %v549_v44  ;;  %v817_v3 = vadd.f32 %v816_v61, %v815_v48  ;;  %v629_v48 = vadd.s32 160, %v1593_v51  ;;  %v785_v42 = vsel %vm689_vm10, %v1837_v40, 0.0  ;;  %v929_v54 = vsel %vm802_vm6, %v886_v27, 0.0 }
  0xdc   : > { %v919_v15 = vsel %vm802_vm6, %v881_v62, 0.0  ;;  %590 = vst.msk [vmem:[%s1547_s26 + $0x3c] sm:$0xf] %vm574_vm3, %v557_v59  ;;  %v630_v62 = vadd.s32 168, %v1593_v51  ;;  %v830_v12 = vsel %vm802_vm6, %v784_v53, 0.0  ;;  %v832_v20 = vsel %vm802_vm6, %v785_v42, 0.0 }
  0xdd   : > { %v819_v2 = vadd.f32 %v1701_v52, %v817_v3  ;;  %v920_v35 = vadd.f32 %v919_v15, %v918_v34  ;;  %v519_v45 = vpop.f32.mrf.mxu2  ;;  %v539_v38 = vpop.f32.mrf.mxu3  ;;  %605 = vst.msk [vmem:[%s1547_s26 + $0x78] sm:$0xf] %vm574_vm3, %v572_v58  ;;  %v662_v40 = vadd.s32 %v1606_v56, %v629_v48  ;;  %v889_v15 = vmul.f32 %v785_v42, %v785_v42 }
  0xde   : > { %v1876_v22 = vadd.f32 %v1534_v24, %v519_v45  ;;  %v1907_v59 = vadd.f32 %v1534_v24, %v539_v38  ;;  %v788_v24 = vsel %vm692_vm5, %v1617_v63, 0.0  ;;  %v663_v63 = vadd.s32 %v1606_v56, %v630_v62 }
  0xdf   : > { %v821_v52 = vadd.f32 %v1731_v10, %v819_v2  ;;  %v922_v25 = vadd.f32 %v1709_v55, %v920_v35  ;;  %v783_v10 = vsel %vm687_vm7, %v1725_v6, 0.0  ;;  %v891_v2 = vmul.f32 %v1807_v13, %v1807_v13 }
  0xe0   : > { %v565_v33 = vpack.c.bf16 %v1876_v22, %v1876_v22  ;;  %v887_v44 = vmul.f32 %v783_v10, %v783_v10  ;;  %v828_v4 = vsel %vm802_vm6, %v783_v10, 0.0  ;;  %v573_v32 = vpack.c.bf16 %v1907_v59, %v1907_v59 }
  0xe1   : > { %v823_v37 = vadd.f32 %v822_v5, %v821_v52  ;;  %v924_v55 = vadd.f32 %v1748_v18, %v922_v25  ;;  %v826_v18 = vsel %vm802_vm6, %v782_v23, 0.0  ;;  %v888_v5 = vmul.f32 %v784_v53, %v784_v53 }
  0xe2   : > { %598 = vst.msk [vmem:[%s1547_s26 + $0x5c] sm:$0xf] %vm574_vm3, %v565_v33  ;;  %v931_v11 = vsel %vm802_vm6, %v887_v44, 0.0  ;;  %v892_v23 = vmul.f32 %v788_v24, %v788_v24  ;;  %v1935_v52 = vsel %vm698_vm8, %v1579_v43, 0.0  ;;  %v634_v13 = vadd.s32 200, %v1593_v51 }
  0xe3   : > { %v926_v50 = vadd.f32 %v925_v26, %v924_v55  ;;  %v825_v6 = vadd.f32 %v824_v31, %v823_v37  ;;  %606 = vst.msk [vmem:[%s1547_s26 + $0x7c] sm:$0xf] %vm574_vm3, %v573_v32  ;;  %v933_v47 = vsel %vm802_vm6, %v888_v5, 0.0  ;;  %vm694_vm3 = vcmp.lt.s32.totalorder %v662_v40, 512 }
  0xe4   : > { %v935_v26 = vsel %vm802_vm6, %v889_v15, 0.0  ;;  %v789_v33 = vsel %vm693_vm11, %v1660_v29, 0.0  ;;  %vm695_vm12 = vcmp.lt.s32.totalorder %v663_v63, 512  ;;  %v939_v37 = vsel %vm802_vm6, %v891_v2, 0.0 }
  0xe5   : > { %v827_v60 = vadd.f32 %v826_v18, %v825_v6  ;;  %v928_v61 = vadd.f32 %v927_v39, %v926_v50  ;;  %v898_v43 = vmul.f32 %v1935_v52, %v1935_v52  ;;  %v665_v55 = vadd.s32 %v1606_v56, %v632_v21 }
  0xe6   : > { %v838_v38 = vsel %vm802_vm6, %v788_v24, 0.0  ;;  %v790_v39 = vsel %vm694_vm3, %v1715_v0, 0.0  ;;  %v667_v50 = vadd.s32 %v1606_v56, %v634_v13  ;;  %v791_v53 = vsel %vm695_vm12, %v1772_v28, 0.0 }
  0xe7   : > { %v829_v34 = vadd.f32 %v828_v4, %v827_v60  ;;  %v930_v3 = vadd.f32 %v929_v54, %v928_v61  ;;  %v941_v6 = vsel %vm802_vm6, %v892_v23, 0.0  ;;  %v636_v44 = vadd.s32 216, %v1593_v51 }
  0xe8   : > { %v840_v58 = vsel %vm802_vm6, %v789_v33, 0.0  ;;  %v894_v60 = vmul.f32 %v790_v39, %v790_v39  ;;  %v668_v0 = vadd.s32 %v1606_v56, %v635_v14  ;;  %vm697_vm14 = vcmp.lt.s32.totalorder %v665_v55, 512 }
  0xe9   : > { %v831_v35 = vadd.f32 %v830_v12, %v829_v34  ;;  %v932_v45 = vadd.f32 %v931_v11, %v930_v3  ;;  %v792_v42 = vsel %vm696_vm13, %v1828_v30, 0.0  ;;  %vm699_vm15 = vcmp.lt.s32.totalorder %v667_v50, 512 }
  0xea   : > { %v842_v62 = vsel %vm802_vm6, %v790_v39, 0.0  ;;  %v637_v54 = vadd.s32 224, %v1593_v51  ;;  %v669_v32 = vadd.s32 %v1606_v56, %v636_v44  ;;  %v793_v24 = vsel %vm697_vm14, %v1876_v22, 0.0 }
  0xeb   : > { %v934_v25 = vadd.f32 %v933_v47, %v932_v45  ;;  %v833_v57 = vadd.f32 %v832_v20, %v831_v35  ;;  %v945_v34 = vsel %vm802_vm6, %v894_v60, 0.0  ;;  %v844_v3 = vsel %vm802_vm6, %v791_v53, 0.0 }
  0xec   : > { %v896_v40 = vmul.f32 %v792_v42, %v792_v42  ;;  %v638_v30 = vadd.s32 232, %v1593_v51  ;;  %vm700_vm0 = vcmp.lt.s32.totalorder %v668_v0, 512  ;;  %v846_v16 = vsel %vm802_vm6, %v792_v42, 0.0 }
  0xed   : > { %v835_v31 = vadd.f32 %v1751_v1, %v833_v57  ;;  %v936_v10 = vadd.f32 %v935_v26, %v934_v25  ;;  %v893_v1 = vmul.f32 %v789_v33, %v789_v33  ;;  %v670_v2 = vadd.s32 %v1606_v56, %v637_v54 }
  0xee   : > { %v897_v35 = vmul.f32 %v793_v24, %v793_v24  ;;  %v639_v45 = vadd.s32 240, %v1593_v51  ;;  %v795_v22 = vsel %vm699_vm15, %v1633_v7, 0.0  ;;  %vm701_vm1 = vcmp.lt.s32.totalorder %v669_v32, 512 }
  0xef   : > { %v837_v27 = vadd.f32 %v1867_v17, %v835_v31  ;;  %v938_v29 = vadd.f32 %v1795_v9, %v936_v10  ;;  %v895_v9 = vmul.f32 %v791_v53, %v791_v53  ;;  %v943_v28 = vsel %vm802_vm6, %v893_v1, 0.0 }
  0xf0   : > { %v949_v20 = vsel %vm802_vm6, %v896_v40, 0.0  ;;  %v848_v21 = vsel %vm802_vm6, %v793_v24, 0.0  ;;  %v671_v23 = vadd.s32 %v1606_v56, %v638_v30  ;;  %v640_v25 = vadd.s32 248, %v1593_v51 }
  0xf1   : > { %v940_v48 = vadd.f32 %v939_v37, %v938_v29  ;;  %v839_v18 = vadd.f32 %v838_v38, %v837_v27  ;;  %v947_v15 = vsel %vm802_vm6, %v895_v9, 0.0  ;;  %v850_v57 = vsel %vm802_vm6, %v1935_v52, 0.0 }
  0xf2   : > { %v796_v13 = vsel %vm700_vm0, %v1719_v36, 0.0  ;;  %v899_v7 = vmul.f32 %v795_v22, %v795_v22  ;;  %vm702_vm2 = vcmp.lt.s32.totalorder %v670_v2, 512  ;;  %v951_v33 = vsel %vm802_vm6, %v897_v35, 0.0 }
  0xf3   : > { %v841_v17 = vadd.f32 %v840_v58, %v839_v18  ;;  %v942_v61 = vadd.f32 %v941_v6, %v940_v48  ;;  %v672_v31 = vadd.s32 %v1606_v56, %v639_v45  ;;  %v953_v10 = vsel %vm802_vm6, %v898_v43, 0.0 }
  0xf4   : > { %v797_v37 = vsel %vm701_vm1, %v1776_v41, 0.0  ;;  %v852_v55 = vsel %vm802_vm6, %v795_v22, 0.0  ;;  %v900_v52 = vmul.f32 %v796_v13, %v796_v13  ;;  %vm703_vm4 = vcmp.lt.s32.totalorder %v671_v23, 512 }
  0xf5   : > { %v843_v4 = vadd.f32 %v842_v62, %v841_v17  ;;  %v944_v5 = vadd.f32 %v943_v28, %v942_v61  ;;  %v673_v36 = vadd.s32 %v1606_v56, %v640_v25  ;;  %v798_v38 = vsel %vm702_vm2, %v1820_v19, 0.0 }
  0xf6   : > { %v955_v29 = vsel %vm802_vm6, %v899_v7, 0.0  ;;  %v854_v1 = vsel %vm802_vm6, %v796_v13, 0.0  ;;  %v901_v50 = vmul.f32 %v797_v37, %v797_v37  ;;  %vm704_vm5 = vcmp.lt.s32.totalorder %v672_v31, 512 }
  0xf7   : > { %v845_v11 = vadd.f32 %v844_v3, %v843_v4  ;;  %v946_v12 = vadd.f32 %v945_v34, %v944_v5  ;;  %v799_v41 = vsel %vm703_vm4, %v1872_v46, 0.0  ;;  %v957_v6 = vsel %vm802_vm6, %v900_v52, 0.0 }
  0xf8   : > { %v856_v48 = vsel %vm802_vm6, %v797_v37, 0.0  ;;  %v902_v18 = vmul.f32 %v798_v38, %v798_v38  ;;  %vm705_vm7 = vcmp.lt.s32.totalorder %v673_v36, 512  ;;  %v800_v44 = vsel %vm704_vm5, %v1899_v49, 0.0 }
  0xf9   : > { %v948_v63 = vadd.f32 %v947_v15, %v946_v12  ;;  %v847_v47 = vadd.f32 %v846_v16, %v845_v11  ;;  %v959_v58 = vsel %vm802_vm6, %v901_v50, 0.0  ;;  %v858_v60 = vsel %vm802_vm6, %v798_v38, 0.0 }
  0xfa   : > { %v903_v0 = vmul.f32 %v799_v41, %v799_v41  ;;  %v801_v46 = vsel %vm705_vm7, %v1907_v59, 0.0  ;;  %v961_v61 = vsel %vm802_vm6, %v902_v18, 0.0  ;;  %v860_v42 = vsel %vm802_vm6, %v799_v41, 0.0 }
  0xfb   : > { %v950_v26 = vadd.f32 %v949_v20, %v948_v63  ;;  %v849_v8 = vadd.f32 %v848_v21, %v847_v47  ;;  %v904_v28 = vmul.f32 %v800_v44, %v800_v44  ;;  %v862_v49 = vsel %vm802_vm6, %v800_v44, 0.0 }
  0xfc   : > { %v963_v4 = vsel %vm802_vm6, %v903_v0, 0.0  ;;  %v905_v5 = vmul.f32 %v801_v46, %v801_v46  ;;  %v864_v59 = vsel %vm802_vm6, %v801_v46, 0.0  ;;  %vm872_vm8 = vcmask 516096  }
  0xfd   : > { %v851_v14 = vadd.f32 %v850_v57, %v849_v8  ;;  %v952_v51 = vadd.f32 %v951_v33, %v950_v26  ;;  %v965_v34 = vsel %vm802_vm6, %v904_v28, 0.0 }
  0xfe   : > { %v967_v30 = vsel %vm802_vm6, %v905_v5, 0.0 }
  0xff   : > { %v853_v39 = vadd.f32 %v852_v55, %v851_v14  ;;  %v954_v27 = vadd.f32 %v953_v10, %v952_v51 }
 0x101   : > { %v956_v43 = vadd.f32 %v955_v29, %v954_v27  ;;  %v855_v53 = vadd.f32 %v854_v1, %v853_v39 }
 0x103   : > { %v857_v56 = vadd.f32 %v856_v48, %v855_v53  ;;  %v958_v19 = vadd.f32 %v957_v6, %v956_v43 }
 0x105   : > { %v859_v17 = vadd.f32 %v858_v60, %v857_v56  ;;  %v960_v9 = vadd.f32 %v959_v58, %v958_v19 }
 0x107   : > { %v861_v62 = vadd.f32 %v860_v42, %v859_v17  ;;  %v962_v54 = vadd.f32 %v961_v61, %v960_v9 }
 0x109   : > { %v964_v32 = vadd.f32 %v963_v4, %v962_v54  ;;  %v863_v24 = vadd.f32 %v862_v49, %v861_v62 }
 0x10b   : > { %v966_v3 = vadd.f32 %v965_v34, %v964_v32  ;;  %v865_v40 = vadd.f32 %v864_v59, %v863_v24 }
 0x10d   : > { %v866_v11 = vrot.slane %v865_v40, 4  ;;  %v968_v12 = vadd.f32 %v967_v30, %v966_v3 }
 0x10f   : > { %v867_v15 = vadd.f32 %v866_v11, %v865_v40  ;;  %v969_v16 = vrot.slane %v968_v12, 4 }
 0x111   : > { %v868_v2 = vrot.slane %v867_v15, 2  ;;  %v970_v35 = vadd.f32 %v969_v16, %v968_v12 }
 0x113   : > { %v869_v45 = vadd.f32 %v868_v2, %v867_v15  ;;  %v971_v22 = vrot.slane %v970_v35, 2 }
 0x115   : > { %v870_v63 = vrot.slane %v869_v45, 1  ;;  %v972_v47 = vadd.f32 %v971_v22, %v970_v35 }
 0x117   : > { %v871_v20 = vadd.f32 %v870_v63, %v869_v45  ;;  %v973_v21 = vrot.slane %v972_v47, 1 }
 0x119   : > { %873 = vst.msk [vmem:[%s242_s10] sm:$0x1] %vm872_vm8, %v871_v20  ;;  %v974_v23 = vadd.f32 %v973_v21, %v972_v47 }
 0x11b   : > { %975 = vst.msk [vmem:[%s242_s10 + $0x1] sm:$0x1] %vm872_vm8, %v974_v23 }
 0x11c   : > { %1345 = shalt.err (!%p1342_p5)
}
 0x11d   : > { %1261 = dma.vmem_to_hbm [thread:$0]  (%p1464_p4), %s1003_s11, 32, %s1005_s12, %s985_s18  }
 0x11e PF: > { %p1267_p6 = scmp.ge.s32.totalorder %s1396_s20, 2  ;;  %s1027_s30 = sand.u32 1, %s1376_s15  }
 0x11f   : > { %s1028_s5 = scalar_lea.sflag [#allocation3], %s1027_s30 }
 0x120   : > { %p1264_p7 = pnand %p1267_p6, %p1471_p8 }
 0x122   : > { %p1265_p9 = pneg %p1264_p7 }
 0x124   : > { %1371 = dma.done.wait (%p1265_p9), %s1028_s5, 32  }
 0x125   : > { %1373 = vsyncadd (%p1265_p9), %s1028_s5, 4294967264  ;;  %s18_s20 = sadd.s32 1, %s1396_s20   ;;  %s2047_s15 = smov %s1380_s16 }
 0x126   : > { %p15_p10 = scmp.ge.s32.totalorder %s18_s20, 4   ;;  %s2048_s16 = smov %s1384_s17 }
 0x127   : > { %s2049_s17 = smov %s1477_s28  ;;  %s2050_s18 = smov %s1392_s19 }
 0x128   : > { %s2051_s19 = smov %s2053_s23  ;;  %17 = sbr.rel (!%p15_p10) target bundleno = 4 (0x4), region = 85 }
 0x12d   :  { %1034 = vsyncpa [#allocation3], 1 }
 0x12e   :  { %1036 = vsyncpa [#allocation3 + $0x1], 1 }

</bundles_post_ra>
